<compile_context>
chip_gen: v7x
topology: tpu7x:2x2x1
jax: 0.10.0
libtpu: 0.0.40
codegen_flags: <defaults>
</compile_context>

<pallas_src>
import jax
import jax.numpy as jnp
from jax.experimental import pallas as pl
from jax.experimental.pallas import tpu as pltpu


_TARGET_STEP_BYTES = 2 << 20   # aim for >= ~2 MiB of in+out HBM traffic per grid step
_MAX_STEP_BYTES = 4 << 20      # cap so 2x double-buffering stays well under scoped VMEM
_VMEM_LIMIT_BYTES = 32 << 20   # explicit scoped-VMEM limit (safe on v5e/v6e/v7x)
_FMA_UNROLL_MAX_CIN = 8        # <= this: unrolled VPU FMA; otherwise MXU jnp.dot


def _choose_tiling(n_batch, hw, bytes_per_pixel):
    """Pick (batch_block, tile_hw) so one grid step carries ~1-4 MiB of traffic.

    bytes_per_pixel = (sum_cin + c_total) * itemsize  (per batch element, per pixel,
    counting both the input read and the output write).
    """
    max_px = max(128, _MAX_STEP_BYTES // bytes_per_pixel)   # pixels (incl. batch fold)

    if hw > max_px:
        # Tile the pixel axis; one batch element per step already hits the cap.
        tile_hw = max(128, min((max_px // 128) * 128, (hw // 128) * 128))
        nb = 1
    else:
        # Whole image per step; fold batch elements to amortize per-step overhead.
        tile_hw = hw
        want = max(1, _TARGET_STEP_BYTES // (hw * bytes_per_pixel))
        cap = max(1, max_px // hw)
        nb = int(min(n_batch, want, cap))

    # v7x has 2 TensorCores: guarantee >= 2 grid steps when there is enough work.
    if pl.cdiv(n_batch, nb) * pl.cdiv(hw, tile_hw) < 2:
        if n_batch >= 2:
            nb = pl.cdiv(n_batch, 2)
        elif hw >= 256:
            tile_hw = ((pl.cdiv(hw, 2) + 127) // 128) * 128
    return nb, tile_hw


def _make_fuse_kernel(branch_meta, num_inputs, has_conv_any):
    """branch_meta: static list of (input_idx, weight_row, cin, cout, has_conv)."""

    def kernel(*refs):
        o_ref = refs[-1]                      # (nb, c_total, tile_hw)
        x_refs = refs[:num_inputs]            # each (nb, cin_i, tile_hw)
        if has_conv_any:
            w_all = refs[num_inputs][...].astype(jnp.float32)      # (rows, max_cin)
            b_all = refs[num_inputs + 1][...].astype(jnp.float32)  # (rows, 1)

        parts = []
        for (idx, row, cin, cout, has_conv) in branch_meta:
            x = x_refs[idx][...]              # (nb, cin, tile_hw)
            if not has_conv:
                # Identity branch: straight lane-dense copy into the staged concat.
                parts.append(x.astype(o_ref.dtype))
                continue

            w = w_all[row:row + cout, :cin]   # (cout, cin) static slice of packed weights
            b = b_all[row:row + cout, :]      # (cout, 1)
            xf = x.astype(jnp.float32)
            nb = xf.shape[0]

            if cin <= _FMA_UNROLL_MAX_CIN:
                # Unrolled VPU broadcast-FMA: (1,cout,1)*(nb,1,tile) terms.
                y = w[None, :, 0:1] * xf[:, 0:1, :]
                for c in range(1, cin):
                    y = y + w[None, :, c:c + 1] * xf[:, c:c + 1, :]
            else:
                # MXU path: one (cout,cin)x(cin,tile) matmul per folded batch element.
                ys = [jnp.dot(w, xf[n], preferred_element_type=jnp.float32)
                      for n in range(nb)]
                y = jnp.stack(ys, axis=0)

            # f32 epilogue kept for exactness; single cast to the output dtype.
            y = jnp.maximum(y + b[None, :, :], 0.0)
            parts.append(y.astype(o_ref.dtype))

        # Stage the fused concat in registers and emit ONE dense, unmasked store.
        o_ref[...] = jnp.concatenate(parts, axis=1)

    return kernel


@jax.jit
def fuse_layer_forward(params, *inputs):
    """params[i] is None (Identity) or {'w': (cout,cin), 'bias': (cout,1)} BN-folded."""
    assert len(params) == len(inputs)
    N, _, H, W = inputs[0].shape
    dtype = inputs[0].dtype
    for x in inputs:
        assert x.ndim == 4 and x.shape[0] == N and x.shape[2:] == (H, W), \
            "all inputs must share (N, H, W)"
        assert x.dtype == dtype, "all inputs must share dtype (torch.cat would error)"
    HW = H * W
    itemsize = jnp.dtype(dtype).itemsize

    # Static per-branch metadata: (input_idx, weight_row, cin, cout, has_conv).
    branch_meta = []
    conv_ws, conv_bs = [], []
    c_total, row = 0, 0
    for i, (p, x) in enumerate(zip(params, inputs)):
        cin = x.shape[1]
        if p is None:
            branch_meta.append((i, -1, cin, cin, False))
            c_total += cin
        else:
            cout, cin_w = p["w"].shape
            assert cin_w == cin, "conv weight cin mismatch with input channels"
            branch_meta.append((i, row, cin, cout, True))
            conv_ws.append(p["w"].astype(jnp.float32))
            conv_bs.append(p["bias"].astype(jnp.float32))
            row += cout
            c_total += cout
    has_conv_any = bool(conv_ws)

    sum_cin = sum(x.shape[1] for x in inputs)
    nb, tile_hw = _choose_tiling(N, HW, (sum_cin + c_total) * itemsize)
    grid = (pl.cdiv(N, nb), pl.cdiv(HW, tile_hw))

    # Inputs as (N, C, HW): a free reshape in NCHW — lanes = pixels, sublanes = channels.
    x_ops = [x.reshape(N, x.shape[1], HW) for x in inputs]
    in_specs = [pl.BlockSpec((nb, x.shape[1], tile_hw), lambda b, t: (b, 0, t))
                for x in inputs]

    extra_ops, extra_specs = [], []
    if has_conv_any:
        # Pack all conv weights / biases into two operands (fewer BlockSpecs,
        # index_maps and double-buffers than two tiny operands per branch).
        max_cin = max(w.shape[1] for w in conv_ws)
        rows = sum(w.shape[0] for w in conv_ws)
        w_packed = jnp.zeros((rows, max_cin), jnp.float32)
        b_packed = jnp.zeros((rows, 1), jnp.float32)
        r = 0
        for w, b in zip(conv_ws, conv_bs):
            w_packed = w_packed.at[r:r + w.shape[0], :w.shape[1]].set(w)
            b_packed = b_packed.at[r:r + w.shape[0], :].set(b)
            r += w.shape[0]
        extra_ops = [w_packed, b_packed]
        extra_specs = [pl.BlockSpec((rows, max_cin), lambda b, t: (0, 0)),
                       pl.BlockSpec((rows, 1), lambda b, t: (0, 0))]

    flops = 2 * N * HW * sum(m[3] * m[2] for m in branch_meta if m[4])
    bytes_accessed = (sum(int(x.size) for x in x_ops) + N * c_total * HW) * itemsize
    bytes_accessed += sum(int(op.size) * 4 for op in extra_ops)

    kernel = _make_fuse_kernel(branch_meta, len(inputs), has_conv_any)

    out = pl.pallas_call(
        kernel,
        out_shape=jax.ShapeDtypeStruct((N, c_total, HW), dtype),
        grid_spec=pltpu.PrefetchScalarGridSpec(
            num_scalar_prefetch=0,
            grid=grid,
            in_specs=in_specs + extra_specs,
            out_specs=pl.BlockSpec((nb, c_total, tile_hw), lambda b, t: (b, 0, t)),
        ),
        compiler_params=pltpu.CompilerParams(
            dimension_semantics=("parallel", "parallel"),
            vmem_limit_bytes=_VMEM_LIMIT_BYTES),
        cost_estimate=pl.CostEstimate(
            flops=flops, transcendentals=0, bytes_accessed=int(bytes_accessed)),
    )(*(x_ops + extra_ops))

    return out.reshape(N, c_total, H, W)


def make_fuse_layer_params(channel_sizes, key):
    """Deterministic init mirroring FuseLayer.__init__, BN folded for inference.

    Returns (params, raw): `params` are the kernel operands (folded w/bias or
    None for Identity); `raw` keeps the unfolded conv/BN params for reference.
    """
    eps = 1e-5
    params, raw = [], []
    for idx, (cin, cout) in enumerate(zip(channel_sizes[:-1], channel_sizes[1:])):
        if cin == cout:
            params.append(None)
            raw.append(None)
            continue
        k_w, k_b = jax.random.split(jax.random.fold_in(key, idx))
        bound = 1.0 / (cin ** 0.5)
        w_conv = jax.random.uniform(k_w, (cout, cin), jnp.float32, -bound, bound)
        b_conv = jax.random.uniform(k_b, (cout,), jnp.float32, -bound, bound)
        # BatchNorm2d default init: gamma=1, beta=0, running_mean=0, running_var=1.
        gamma = jnp.ones((cout,), jnp.float32)
        beta = jnp.zeros((cout,), jnp.float32)
        r_mean = jnp.zeros((cout,), jnp.float32)
        r_var = jnp.ones((cout,), jnp.float32)
        scale = gamma / jnp.sqrt(r_var + eps)
        # Exact fold (any sign of scale): scale*(W@x+b-mean)+beta == (scale*W)@x + bias'
        params.append({
            "w": w_conv * scale[:, None],                         # (cout, cin)
            "bias": (scale * (b_conv - r_mean) + beta)[:, None],  # (cout, 1)
        })
        raw.append({"w": w_conv, "b": b_conv, "gamma": gamma, "beta": beta,
                    "mean": r_mean, "var": r_var, "eps": eps})
    return params, raw


def _reference(raw, inputs):
    """Plain-JAX reference: unfolded conv -> BN(inference) -> ReLU, then concat."""
    outs = []
    for r, x in zip(raw, inputs):
        if r is None:
            outs.append(x)
            continue
        y = jnp.einsum("oc,nchw->nohw", r["w"], x) + r["b"].reshape(1, -1, 1, 1)
        y = (y - r["mean"].reshape(1, -1, 1, 1)) / jnp.sqrt(
            r["var"].reshape(1, -1, 1, 1) + r["eps"])
        y = y * r["gamma"].reshape(1, -1, 1, 1) + r["beta"].reshape(1, -1, 1, 1)
        outs.append(jnp.maximum(y, 0.0))
    return jnp.concatenate(outs, axis=1)


if __name__ == "__main__":
    key = jax.random.PRNGKey(0)

    # Test 1: channel_sizes = [4, 8, 8] -> Conv(4->8)+BN+ReLU, Identity(8->8).
    channel_sizes = [4, 8, 8]
    params, raw = make_fuse_layer_params(channel_sizes, key)
    k0, k1 = jax.random.split(jax.random.fold_in(key, 100))
    x0 = jax.random.normal(k0, (2, 4, 16, 16), jnp.float32)   # NCHW
    x1 = jax.random.normal(k1, (2, 8, 16, 16), jnp.float32)   # NCHW
    out = jax.block_until_ready(fuse_layer_forward(params, x0, x1))
    ref = _reference(raw, [x0, x1])
    assert out.shape == (2, 16, 16, 16), out.shape
    assert jnp.allclose(out, ref, atol=1e-5, rtol=1e-5), "mismatch (test 1)"

    # Test 2: N=1 exercises the v7x two-step HW-split path.
    out1 = jax.block_until_ready(fuse_layer_forward(params, x0[:1], x1[:1]))
    assert jnp.allclose(out1, ref[:1], atol=1e-5, rtol=1e-5), "mismatch (test 2)"

    # Test 3: channel_sizes = [16, 24, 24] exercises the packed-weight MXU dot
    # path and a non-sublane-aligned concat boundary.  Loose tolerance: default
    # f32 matmul precision may differ between the in-kernel MXU path and XLA's
    # einsum reference (both carry ~1e-3 relative error); structural errors
    # would still be O(1).
    channel_sizes2 = [16, 24, 24]
    params2, raw2 = make_fuse_layer_params(channel_sizes2, jax.random.fold_in(key, 7))
    k2, k3 = jax.random.split(jax.random.fold_in(key, 200))
    y0 = jax.random.normal(k2, (2, 16, 8, 8), jnp.float32)
    y1 = jax.random.normal(k3, (2, 24, 8, 8), jnp.float32)
    out2 = jax.block_until_ready(fuse_layer_forward(params2, y0, y1))
    ref2 = _reference(raw2, [y0, y1])
    assert out2.shape == (2, 48, 8, 8), out2.shape
    assert jnp.allclose(out2, ref2, atol=2e-2, rtol=2e-2), "mismatch (test 3)"

    print("KERNEL_OK")
</pallas_src>

<mosaic_0001>
module attributes {stable_mosaic.version = 11 : i64} {
  func.func @kernel(%arg0: i32, %arg1: i32, %arg2: memref<1x4x256xf32, #tpu.memory_space<vmem>>, %arg3: memref<1x8x256xf32, #tpu.memory_space<vmem>>, %arg4: memref<8x4xf32, #tpu.memory_space<vmem>>, %arg5: memref<8x1xf32, #tpu.memory_space<vmem>>, %arg6: memref<1x16x256xf32, #tpu.memory_space<vmem>>) attributes {dimension_semantics = [#tpu.dimension_semantics<parallel>, #tpu.dimension_semantics<parallel>], iteration_bounds = array<i64: 2, 1>, scalar_prefetch = 0 : i64, scratch_operands = 0 : i64, tpu.core_type = #tpu.core_type<tc>, window_params = [{transform_indices = @transform_0, window_bounds = array<i64: 1, 4, 256>}, {transform_indices = @transform_1, window_bounds = array<i64: 1, 8, 256>}, {pipeline_mode = #tpu.pipeline_mode<synchronous>, transform_indices = @transform_2, window_bounds = array<i64: 8, 4>}, {pipeline_mode = #tpu.pipeline_mode<synchronous>, transform_indices = @transform_3, window_bounds = array<i64: 8, 1>}, {transform_indices = @transform_4, window_bounds = array<i64: 1, 16, 256>}]} {
    %c0 = arith.constant 0 : index
    %c0_0 = arith.constant 0 : index
    %0 = vector.load %arg4[%c0, %c0_0] : memref<8x4xf32, #tpu.memory_space<vmem>>, vector<8x4xf32>
    %c0_1 = arith.constant 0 : index
    %c0_2 = arith.constant 0 : index
    %1 = vector.load %arg5[%c0_1, %c0_2] : memref<8x1xf32, #tpu.memory_space<vmem>>, vector<8x1xf32>
    %c0_3 = arith.constant 0 : index
    %c0_4 = arith.constant 0 : index
    %c0_5 = arith.constant 0 : index
    %2 = vector.load %arg2[%c0_3, %c0_4, %c0_5] : memref<1x4x256xf32, #tpu.memory_space<vmem>>, vector<1x4x256xf32>
    %3 = vector.extract_strided_slice %0 {offsets = [0, 0], sizes = [8, 1], strides = [1, 1]} : vector<8x4xf32> to vector<8x1xf32>
    %4 = vector.shape_cast %3 : vector<8x1xf32> to vector<1x8x1xf32>
    %5 = vector.extract_strided_slice %2 {offsets = [0, 0, 0], sizes = [1, 1, 256], strides = [1, 1, 1]} : vector<1x4x256xf32> to vector<1x1x256xf32>
    %6 = vector.broadcast %4 : vector<1x8x1xf32> to vector<1x8x256xf32>
    %7 = vector.broadcast %5 : vector<1x1x256xf32> to vector<1x8x256xf32>
    %8 = arith.mulf %6, %7 : vector<1x8x256xf32>
    %9 = vector.extract_strided_slice %0 {offsets = [0, 1], sizes = [8, 1], strides = [1, 1]} : vector<8x4xf32> to vector<8x1xf32>
    %10 = vector.shape_cast %9 : vector<8x1xf32> to vector<1x8x1xf32>
    %11 = vector.extract_strided_slice %2 {offsets = [0, 1, 0], sizes = [1, 1, 256], strides = [1, 1, 1]} : vector<1x4x256xf32> to vector<1x1x256xf32>
    %12 = vector.broadcast %10 : vector<1x8x1xf32> to vector<1x8x256xf32>
    %13 = vector.broadcast %11 : vector<1x1x256xf32> to vector<1x8x256xf32>
    %14 = arith.mulf %12, %13 : vector<1x8x256xf32>
    %15 = arith.addf %8, %14 : vector<1x8x256xf32>
    %16 = vector.extract_strided_slice %0 {offsets = [0, 2], sizes = [8, 1], strides = [1, 1]} : vector<8x4xf32> to vector<8x1xf32>
    %17 = vector.shape_cast %16 : vector<8x1xf32> to vector<1x8x1xf32>
    %18 = vector.extract_strided_slice %2 {offsets = [0, 2, 0], sizes = [1, 1, 256], strides = [1, 1, 1]} : vector<1x4x256xf32> to vector<1x1x256xf32>
    %19 = vector.broadcast %17 : vector<1x8x1xf32> to vector<1x8x256xf32>
    %20 = vector.broadcast %18 : vector<1x1x256xf32> to vector<1x8x256xf32>
    %21 = arith.mulf %19, %20 : vector<1x8x256xf32>
    %22 = arith.addf %15, %21 : vector<1x8x256xf32>
    %23 = vector.extract_strided_slice %0 {offsets = [0, 3], sizes = [8, 1], strides = [1, 1]} : vector<8x4xf32> to vector<8x1xf32>
    %24 = vector.shape_cast %23 : vector<8x1xf32> to vector<1x8x1xf32>
    %25 = vector.extract_strided_slice %2 {offsets = [0, 3, 0], sizes = [1, 1, 256], strides = [1, 1, 1]} : vector<1x4x256xf32> to vector<1x1x256xf32>
    %26 = vector.broadcast %24 : vector<1x8x1xf32> to vector<1x8x256xf32>
    %27 = vector.broadcast %25 : vector<1x1x256xf32> to vector<1x8x256xf32>
    %28 = arith.mulf %26, %27 : vector<1x8x256xf32>
    %29 = arith.addf %22, %28 : vector<1x8x256xf32>
    %30 = vector.shape_cast %1 : vector<8x1xf32> to vector<1x8x1xf32>
    %31 = vector.broadcast %30 : vector<1x8x1xf32> to vector<1x8x256xf32>
    %32 = arith.addf %29, %31 : vector<1x8x256xf32>
    %cst = arith.constant 0.000000e+00 : f32
    %33 = vector.broadcast %cst : f32 to vector<1x8x256xf32>
    %34 = arith.maximumf %32, %33 : vector<1x8x256xf32>
    %c0_6 = arith.constant 0 : index
    %c0_7 = arith.constant 0 : index
    %c0_8 = arith.constant 0 : index
    %35 = vector.load %arg3[%c0_6, %c0_7, %c0_8] : memref<1x8x256xf32, #tpu.memory_space<vmem>>, vector<1x8x256xf32>
    %36 = tpu.concatenate %34, %35 in 1 : vector<1x8x256xf32>, vector<1x8x256xf32> -> vector<1x16x256xf32>
    %c0_9 = arith.constant 0 : index
    %c0_10 = arith.constant 0 : index
    %c0_11 = arith.constant 0 : index
    %37 = vector.load %arg6[%c0_9, %c0_10, %c0_11] : memref<1x16x256xf32, #tpu.memory_space<vmem>>, vector<1x16x256xf32>
    tpu.vector_store %arg6[%c0_9, %c0_10, %c0_11], %36 {strides = array<i32>} : memref<1x16x256xf32, #tpu.memory_space<vmem>>, vector<1x16x256xf32>,
    return
  }
  func.func @transform_0(%arg0: i32, %arg1: i32) -> (i32, i32, i32) {
    %c0_i32 = arith.constant 0 : i32
    %c0_i32_0 = arith.constant 0 : i32
    return %arg0, %c0_i32, %arg1 : i32, i32, i32
  }
  func.func @transform_1(%arg0: i32, %arg1: i32) -> (i32, i32, i32) {
    %c0_i32 = arith.constant 0 : i32
    %c0_i32_0 = arith.constant 0 : i32
    return %arg0, %c0_i32, %arg1 : i32, i32, i32
  }
  func.func @transform_2(%arg0: i32, %arg1: i32) -> (i32, i32) {
    %c0_i32 = arith.constant 0 : i32
    %c0_i32_0 = arith.constant 0 : i32
    %c0_i32_1 = arith.constant 0 : i32
    return %c0_i32, %c0_i32_0 : i32, i32
  }
  func.func @transform_3(%arg0: i32, %arg1: i32) -> (i32, i32) {
    %c0_i32 = arith.constant 0 : i32
    %c0_i32_0 = arith.constant 0 : i32
    %c0_i32_1 = arith.constant 0 : i32
    return %c0_i32, %c0_i32_0 : i32, i32
  }
  func.func @transform_4(%arg0: i32, %arg1: i32) -> (i32, i32, i32) {
    %c0_i32 = arith.constant 0 : i32
    %c0_i32_0 = arith.constant 0 : i32
    return %arg0, %c0_i32, %arg1 : i32, i32, i32
  }
}

</mosaic_0001>

<bundles_post_ra>
// kernel: fuse_layer_forward.1
= control target key start
LH: loop header
LB: loop body
LE: loop exit
PB: predicated region body
PF: predicated region fallthrough
CT: control target
= control target key end

     0   :  { %s603_s15 = smov 0   ;;  %s605_s16 = smov 0   ;;  %s651_s0 = inlined_call_operand.vmem [shape: f32[2,4,256], index: 0, kind: input, shape index: {}]   ;;  %s652_s1 = inlined_call_operand.vmem [shape: f32[2,8,256], index: 1, kind: input, shape index: {}]   ;;  %s653_s2 = inlined_call_operand.vmem [shape: f32[8,4], index: 2, kind: input, shape index: {}]   ;;  %s654_s3 = inlined_call_operand.vmem [shape: f32[8,1], index: 3, kind: input, shape index: {}]   ;;  %s655_s4 = inlined_call_operand.vmem [shape: f32[2,16,256], index: 4, kind: output, shape index: {}]  }
   0x1   :  { %s607_s17 = smov 0  }
   0x2 LB: > { %s26_s18 = sadd.s32 1, %s568_s16  ;;  %p504_p0 = scmp.ge.s32.totalorder %s572_s17, 1  ;;  %s572_s17 = sphi %s607_s17, %s14_s17   ;;  %s568_s16 = sphi %s605_s16, %s657_s16   ;;  %s564_s15 = sphi %s603_s15, %s656_s15  }
   0x3   : > { %p28_p1 = scmp.ge.s32.totalorder %s26_s18, 2  ;;  %p200_p2 = scmp.lt.s32.totalorder %s572_s17, 3 }
   0x5   : > { %s659_s18 = smov (%p28_p1, %s26_s18), 0  ;;  %p201_p3 = pnand %p504_p0, %p200_p2 }
   0x6   : > { %v273_v0 = vld [vmem:[%s653_s2] sm:$0xff] (!%p201_p3)  ;;  %v574_v1 = vmov (!%p201_p3), 0   ;;  %v575_v2 = vmov (!%p201_p3), 2   ;;  %p244_p4 = scmp.lt.s32.totalorder (!%p201_p3), %s564_s15, 1  ;;  %v576_v3 = vmov (!%p201_p3), 1   ;;  %v577_v4 = vmov (!%p201_p3), 3  }
   0x7   : > { %204 = sbr.rel (%p201_p3) target bundleno = 154 (0x9a), region = 36  ;;  %544 = vset.pattern.permute.xlu0 (!%p201_p3), %v574_v1  ;;  %546 = vset.pattern.permute.xlu1 (!%p201_p3), %v575_v2  ;;  %v274_v5 = vld [vmem:[%s654_s3] sm:$0xff] (!%p201_p3)  ;;  %v282_v8 = vlaneseq (!%p201_p3) }
   0x8   : > { %278 = vperm.xlu0 (!%p201_p3), %544, %v273_v0   ;;  %329 = vperm.xlu1 (!%p201_p3), %546, %v273_v0  }
   0x9   : > { %v283_v9 = vshrl.u32 (!%p201_p3), %v282_v8, 7 }
   0xb   : > { %v284_v10 = vsub.s32 (!%p201_p3), 0, %v283_v9  ;;  %v288_v11 = vsub.s32 (!%p201_p3), 4, %v283_v9  ;;  %v308_v12 = vsub.s32 (!%p201_p3), 1, %v283_v9  ;;  %v312_v13 = vsub.s32 (!%p201_p3), 5, %v283_v9 }
   0xc   : > { %545 = vset.pattern.permute.xlu0 (!%p201_p3), %v576_v3  ;;  %547 = vset.pattern.permute.xlu1 (!%p201_p3), %v577_v4  ;;  %v334_v15 = vsub.s32 (!%p201_p3), 2, %v283_v9  ;;  %v338_v16 = vsub.s32 (!%p201_p3), 6, %v283_v9  ;;  %v360_v17 = vsub.s32 (!%p201_p3), 3, %v283_v9  ;;  %v364_v18 = vsub.s32 (!%p201_p3), 7, %v283_v9 }
   0xd   : > { %303 = vperm.xlu0 (!%p201_p3), %545, %v273_v0   ;;  %355 = vperm.xlu1 (!%p201_p3), %547, %v273_v0  }
   0xe   : > { %s661_s15 = smov (!%p244_p4, %s564_s15), 1 }
   0xf   : > { %s514_s23 = sshll.u32 %s661_s15, 4  ;;  %s515_s24 = sshll.u32 %s661_s15, 5 }
  0x10   : > { %s261_s27 = scalar_lea.vmem %s652_s1, %s514_s23  ;;  %s633_s30 = scalar_lea.vmem %s655_s4, %s515_s24 }
  0x11   : > { %548 = vset.pattern.permute.xlu1 %v574_v1  ;;  %549 = vset.pattern.permute.xlu0 %v574_v1  ;;  %v389_v6 = vld [vmem:[%s261_s27] sm:$0xff]  ;;  %v390_v7 = vld [vmem:[%s261_s27 + $0x8] sm:$0xff]  ;;  %s513_s5 = sshll.u32 %s661_s15, 3 }
  0x12   : > { %382 = vperm.xlu1 %548, %v274_v5   ;;  %393 = vst [vmem:[%s633_s30 + $0x10] sm:$0xff] %v389_v6  ;;  %394 = vst [vmem:[%s633_s30 + $0x18] sm:$0xff] %v390_v7  ;;  %s251_s8 = scalar_lea.vmem %s651_s0, %s513_s5 }
  0x13   : > { %v275_v14 = vld [vmem:[%s251_s8] sm:$0xff] }
  0x14   : > { %v285_v19 = vrot.slane %v275_v14, %v284_v10  ;;  %v289_v20 = vrot.slane %v275_v14, %v288_v11  ;;  %v309_v21 = vrot.slane %v275_v14, %v308_v12  ;;  %v313_v22 = vrot.slane %v275_v14, %v312_v13 }
  0x15   : > { %v335_v23 = vrot.slane %v275_v14, %v334_v15  ;;  %v339_v24 = vrot.slane %v275_v14, %v338_v16  ;;  %v361_v27 = vrot.slane %v275_v14, %v360_v17  ;;  %v365_v28 = vrot.slane %v275_v14, %v364_v18 }
  0x16   : > { %v295_v29 = vrot.slane %v285_v19, %v284_v10  ;;  %v299_v30 = vrot.slane %v289_v20, %v284_v10  ;;  %v319_v31 = vrot.slane %v309_v21, %v308_v12  ;;  %v323_v32 = vrot.slane %v313_v22, %v308_v12 }
  0x17   : > { %v345_v33 = vrot.slane %v335_v23, %v334_v15  ;;  %v349_v34 = vrot.slane %v339_v24, %v334_v15  ;;  %v371_v35 = vrot.slane %v361_v27, %v360_v17  ;;  %v375_v36 = vrot.slane %v365_v28, %v360_v17 }
  0x87   : > { %v279_v25 = vpop.permute.xlu0 %278  ;;  %v330_v26 = vpop.permute.xlu1 %329 }
  0x88   : > { %v300_v39 = vmul.f32 %v295_v29, %v279_v25  ;;  %v301_v40 = vmul.f32 %v299_v30, %v279_v25  ;;  %v350_v43 = vmul.f32 %v345_v33, %v330_v26  ;;  %v351_v44 = vmul.f32 %v349_v34, %v330_v26 }
  0x8c   : > { %v304_v37 = vpop.permute.xlu0 %303  ;;  %v356_v38 = vpop.permute.xlu1 %355 }
  0x8d   : > { %v324_v41 = vmul.f32 %v319_v31, %v304_v37  ;;  %v325_v42 = vmul.f32 %v323_v32, %v304_v37  ;;  %v376_v47 = vmul.f32 %v371_v35, %v356_v38  ;;  %v377_v48 = vmul.f32 %v375_v36, %v356_v38 }
  0x8f   : > { %v326_v45 = vadd.f32 %v324_v41, %v300_v39  ;;  %v327_v46 = vadd.f32 %v325_v42, %v301_v40 }
  0x91   : > { %v352_v49 = vadd.f32 %v350_v43, %v326_v45  ;;  %v353_v50 = vadd.f32 %v351_v44, %v327_v46  ;;  %v383_v51 = vpop.permute.xlu1 %382 }
  0x93   : > { %v378_v52 = vadd.f32 %v376_v47, %v352_v49  ;;  %v379_v53 = vadd.f32 %v377_v48, %v353_v50 }
  0x95   : > { %v385_v54 = vadd.f32 %v383_v51, %v378_v52  ;;  %v386_v55 = vadd.f32 %v383_v51, %v379_v53 }
  0x97   : > { %v387_v56 = vmax.f32 %v385_v54, 0.0  ;;  %v388_v57 = vmax.f32 %v386_v55, 0.0 }
  0x99   : > { %391 = vst [vmem:[%s633_s30] sm:$0xff] %v387_v56  ;;  %392 = vst [vmem:[%s633_s30 + $0x8] sm:$0xff] %v388_v57 }
  0x9a PF: > { %s14_s17 = sadd.s32 1, %s572_s17   ;;  %s656_s15 = smov %s568_s16 }
  0x9b   : > { %p11_p5 = scmp.ge.s32.totalorder %s14_s17, 4   ;;  %s657_s16 = smov %s659_s18 }
  0x9d   :  { %13 = sbr.rel (!%p11_p5) target bundleno = 2 (0x2), region = 69 }

</bundles_post_ra>
